<compile_context>
chip_gen: v6e
topology: v6e:2x2x1
jax: 0.10.0
libtpu: 0.0.40
codegen_flags: <defaults>
</compile_context>

<pallas_src>
import functools

import jax
import jax.numpy as jnp
from jax.experimental import pallas as pl
from jax.experimental.pallas import tpu as pltpu


def _dwconv_sum_kernel(w_ref, x_ref, o_ref, xpad_ref, *,
                       cin, ks, stride, padding, bt, h, w, h_out, wacc):
    """Channel-summed depthwise conv on a W-packed batch tile.

    w_ref   : (cin*ks*ks,) SMEM      pre-summed weights w_eff[c, dh, dw], flattened
    x_ref   : (bt, cin, h, w) VMEM   un-padded input tile (bt batch images)
    o_ref   : (1, h_out, wacc) VMEM  packed output, wacc = bt*(w + 2*padding)
    xpad_ref: (cin, h+2p, wacc+ks-1) VMEM scratch, zero-filled halo / packing buffer
    """
    hp = h + 2 * padding
    wpimg = w + 2 * padding

    # Build the packed, zero-padded planes: images side-by-side along lanes. The zero
    # border of each image isolates it from its neighbour, so running the conv over the
    # packed width is exact for each image's own output columns.
    xpad_ref[...] = jnp.zeros_like(xpad_ref)
    for b in range(bt):                                    # static unroll (bt is small)
        col0 = b * wpimg + padding
        xpad_ref[:, padding:padding + h, col0:col0 + w] = x_ref[b].astype(xpad_ref.dtype)

    acc = jnp.zeros((h_out, wacc), jnp.float32)
    for c in range(cin):
        xc = xpad_ref[c]                                   # (hp, wacc + ks - 1)
        for dw in range(ks):
            # Hoisted lane shift: one shifted copy per (c, dw), reused for all dh.
            xs = jax.lax.slice(xc, (0, dw), (hp, dw + wacc))
            for dh in range(ks):
                wv = w_ref[c * ks * ks + dh * ks + dw]     # scalar from SMEM
                if stride == 1:
                    rows = jax.lax.slice(xs, (dh, 0), (dh + h_out, wacc))
                else:
                    # TODO(synk): for stride > 1, read strided rows straight from the ref
                    # (pl.ds(dh, h_out, stride)) instead of compacting in-register.
                    rows = jax.lax.slice(
                        xs, (dh, 0), (dh + (h_out - 1) * stride + 1, wacc), (stride, 1))
                acc = acc + wv * rows
    o_ref[0] = acc.astype(o_ref.dtype)


def _pick_batch_tile(n, lanes_per_img, target_lanes=128):
    """Smallest divisor of n whose packed width reaches ~target_lanes lanes, else n."""
    for d in range(1, n + 1):
        if n % d == 0 and d * lanes_per_img >= target_lanes:
            return d
    return n


def depthwise_conv_sum(x, weight, *, stride=1, padding=1):
    """x: (N, C, H, W), weight: (K, 1, ks, ks) -> (N, 1, H_out, W_out).

    Matches nn.Conv2d(C, K, ks, stride=[stride, 1], padding=padding, groups=C, bias=False)
    followed by sum over output channels (keepdim=True).
    """
    n, cin, h, w = x.shape
    k, _, ks, _ = weight.shape
    assert k % cin == 0, "out_channels must be divisible by groups (=nin)"
    cpg = k // cin

    h_out = (h + 2 * padding - ks) // stride + 1
    w_out = (w + 2 * padding - ks) // 1 + 1            # W-stride is fixed to 1 in module
    wpimg = w + 2 * padding

    # Exact reduction: channel-sum commutes with the (linear-in-weights) conv, so pre-sum
    # the cpg filters that share each input channel.
    w_eff = weight.reshape(cin, cpg, ks, ks).sum(axis=1)
    w_flat = w_eff.reshape(-1).astype(jnp.float32)

    # Pack bt images along the lane (W) axis per grid step (lane-dense output); keep a
    # batch-tile grid so large batches still shard across TensorCores.
    # TODO(synk): for very large C*H*W per image, additionally tile H with a 1-row halo
    # to respect the v7x 64 MiB VMEM budget.
    bt = _pick_batch_tile(n, wpimg)
    num_steps = n // bt
    wacc = bt * wpimg

    kernel = functools.partial(
        _dwconv_sum_kernel, cin=cin, ks=ks, stride=stride, padding=padding,
        bt=bt, h=h, w=w, h_out=h_out, wacc=wacc)

    out_packed = pl.pallas_call(
        kernel,
        out_shape=jax.ShapeDtypeStruct((num_steps, h_out, wacc), x.dtype),
        grid=(num_steps,),
        in_specs=[
            pl.BlockSpec(memory_space=pltpu.MemorySpace.SMEM),        # weights (scalars)
            pl.BlockSpec((bt, cin, h, w), lambda i: (i, 0, 0, 0)),    # un-padded input
        ],
        out_specs=pl.BlockSpec((1, h_out, wacc), lambda i: (i, 0, 0)),
        scratch_shapes=[
            pltpu.VMEM((cin, h + 2 * padding, wacc + ks - 1), jnp.float32),
        ],
        compiler_params=pltpu.CompilerParams(dimension_semantics=("parallel",)),
    )(w_flat, x)

    # Un-pack: (steps, h_out, bt*wpimg) -> (n, 1, h_out, w_out). Only the small,
    # channel-summed output is touched here.
    out = out_packed.reshape(num_steps, h_out, bt, wpimg)[..., :w_out]
    out = out.transpose(0, 2, 1, 3).reshape(n, h_out, w_out)
    return out[:, None]


def _reference(x, weight, *, stride=1, padding=1):
    """Pure-JAX reference matching the PyTorch module."""
    out = jax.lax.conv_general_dilated(
        x, weight,
        window_strides=(stride, 1),
        padding=[(padding, padding), (padding, padding)],
        dimension_numbers=("NCHW", "OIHW", "NCHW"),
        feature_group_count=x.shape[1],
    )
    return jnp.sum(out, axis=1, keepdims=True)


if __name__ == "__main__":
    nin, k, ks, stride, padding = 4, 8, 3, 1, 1        # k % nin == 0 (groups=nin)
    N, H, W = 2, 16, 16

    key = jax.random.PRNGKey(0)
    kx, kw = jax.random.split(key)
    x = jax.random.normal(kx, (N, nin, H, W), dtype=jnp.float32)
    # Conv2d(nin, k, 3, groups=nin, bias=False) weight shape: (k, nin/groups=1, 3, 3)
    weight = jax.random.normal(kw, (k, 1, ks, ks), dtype=jnp.float32) * (1.0 / 3.0)

    out = depthwise_conv_sum(x, weight, stride=stride, padding=padding)
    out = jax.block_until_ready(out)

    ref = jax.block_until_ready(_reference(x, weight, stride=stride, padding=padding))
    assert out.shape == (N, 1, H, W), out.shape
    assert jnp.allclose(out, ref, atol=1e-4, rtol=1e-4), "mismatch vs reference conv"
    print("KERNEL_OK")
</pallas_src>

<mosaic_0001>
module attributes {stable_mosaic.version = 11 : i64} {
  func.func @_dwconv_sum_kernel(%arg0: i32, %arg1: memref<36xf32, #tpu.memory_space<smem>>, %arg2: memref<2x4x16x16xf32, #tpu.memory_space<vmem>>, %arg3: memref<1x16x36xf32, #tpu.memory_space<vmem>>, %arg4: memref<4x18x38xf32, #tpu.memory_space<vmem>>) attributes {dimension_semantics = [#tpu.dimension_semantics<parallel>], iteration_bounds = array<i64: 1>, scalar_prefetch = 0 : i64, scratch_operands = 1 : i64, tpu.core_type = #tpu.core_type<tc>, window_params = [{transform_indices = @transform_0, window_bounds = array<i64: 36>}, {transform_indices = @transform_1, window_bounds = array<i64: 2, 4, 16, 16>}, {transform_indices = @transform_2, window_bounds = array<i64: 1, 16, 36>}]} {
    %cst = arith.constant 0.000000e+00 : f32
    %0 = vector.broadcast %cst : f32 to vector<4x18x38xf32>
    %c0 = arith.constant 0 : index
    %c0_0 = arith.constant 0 : index
    %c0_1 = arith.constant 0 : index
    %1 = vector.load %arg4[%c0, %c0_0, %c0_1] : memref<4x18x38xf32, #tpu.memory_space<vmem>>, vector<4x18x38xf32>
    tpu.vector_store %arg4[%c0, %c0_0, %c0_1], %0 {strides = array<i32>} : memref<4x18x38xf32, #tpu.memory_space<vmem>>, vector<4x18x38xf32>,
    %c0_2 = arith.constant 0 : index
    %c0_3 = arith.constant 0 : index
    %c0_4 = arith.constant 0 : index
    %c0_5 = arith.constant 0 : index
    %2 = vector.load %arg2[%c0_2, %c0_3, %c0_4, %c0_5] : memref<2x4x16x16xf32, #tpu.memory_space<vmem>>, vector<1x4x16x16xf32>
    %3 = vector.shape_cast %2 : vector<1x4x16x16xf32> to vector<4x16x16xf32>
    %c0_6 = arith.constant 0 : index
    %c1 = arith.constant 1 : index
    %c1_7 = arith.constant 1 : index
    %4 = vector.load %arg4[%c0_6, %c1, %c1_7] : memref<4x18x38xf32, #tpu.memory_space<vmem>>, vector<4x16x16xf32>
    tpu.vector_store %arg4[%c0_6, %c1, %c1_7], %3 {strides = array<i32>} : memref<4x18x38xf32, #tpu.memory_space<vmem>>, vector<4x16x16xf32>,
    %c1_8 = arith.constant 1 : index
    %c0_9 = arith.constant 0 : index
    %c0_10 = arith.constant 0 : index
    %c0_11 = arith.constant 0 : index
    %5 = vector.load %arg2[%c1_8, %c0_9, %c0_10, %c0_11] : memref<2x4x16x16xf32, #tpu.memory_space<vmem>>, vector<1x4x16x16xf32>
    %6 = vector.shape_cast %5 : vector<1x4x16x16xf32> to vector<4x16x16xf32>
    %c0_12 = arith.constant 0 : index
    %c1_13 = arith.constant 1 : index
    %c19 = arith.constant 19 : index
    %7 = vector.load %arg4[%c0_12, %c1_13, %c19] : memref<4x18x38xf32, #tpu.memory_space<vmem>>, vector<4x16x16xf32>
    tpu.vector_store %arg4[%c0_12, %c1_13, %c19], %6 {strides = array<i32>} : memref<4x18x38xf32, #tpu.memory_space<vmem>>, vector<4x16x16xf32>,
    %cst_14 = arith.constant 0.000000e+00 : f32
    %8 = vector.broadcast %cst_14 : f32 to vector<16x36xf32>
    %c0_15 = arith.constant 0 : index
    %c0_16 = arith.constant 0 : index
    %c0_17 = arith.constant 0 : index
    %9 = vector.load %arg4[%c0_15, %c0_16, %c0_17] : memref<4x18x38xf32, #tpu.memory_space<vmem>>, vector<1x18x38xf32>
    %10 = vector.shape_cast %9 : vector<1x18x38xf32> to vector<18x38xf32>
    %11 = vector.extract_strided_slice %10 {offsets = [0, 0], sizes = [18, 36], strides = [1, 1]} : vector<18x38xf32> to vector<18x36xf32>
    %c0_18 = arith.constant 0 : index
    %12 = memref.load %arg1[%c0_18] : memref<36xf32, #tpu.memory_space<smem>>
    %13 = vector.extract_strided_slice %11 {offsets = [0, 0], sizes = [16, 36], strides = [1, 1]} : vector<18x36xf32> to vector<16x36xf32>
    %14 = vector.broadcast %12 : f32 to vector<16x36xf32>
    %15 = arith.mulf %14, %13 : vector<16x36xf32>
    %16 = arith.addf %8, %15 : vector<16x36xf32>
    %c3 = arith.constant 3 : index
    %17 = memref.load %arg1[%c3] : memref<36xf32, #tpu.memory_space<smem>>
    %18 = vector.extract_strided_slice %11 {offsets = [1, 0], sizes = [16, 36], strides = [1, 1]} : vector<18x36xf32> to vector<16x36xf32>
    %19 = vector.broadcast %17 : f32 to vector<16x36xf32>
    %20 = arith.mulf %19, %18 : vector<16x36xf32>
    %21 = arith.addf %16, %20 : vector<16x36xf32>
    %c6 = arith.constant 6 : index
    %22 = memref.load %arg1[%c6] : memref<36xf32, #tpu.memory_space<smem>>
    %23 = vector.extract_strided_slice %11 {offsets = [2, 0], sizes = [16, 36], strides = [1, 1]} : vector<18x36xf32> to vector<16x36xf32>
    %24 = vector.broadcast %22 : f32 to vector<16x36xf32>
    %25 = arith.mulf %24, %23 : vector<16x36xf32>
    %26 = arith.addf %21, %25 : vector<16x36xf32>
    %27 = vector.extract_strided_slice %10 {offsets = [0, 1], sizes = [18, 36], strides = [1, 1]} : vector<18x38xf32> to vector<18x36xf32>
    %c1_19 = arith.constant 1 : index
    %28 = memref.load %arg1[%c1_19] : memref<36xf32, #tpu.memory_space<smem>>
    %29 = vector.extract_strided_slice %27 {offsets = [0, 0], sizes = [16, 36], strides = [1, 1]} : vector<18x36xf32> to vector<16x36xf32>
    %30 = vector.broadcast %28 : f32 to vector<16x36xf32>
    %31 = arith.mulf %30, %29 : vector<16x36xf32>
    %32 = arith.addf %26, %31 : vector<16x36xf32>
    %c4 = arith.constant 4 : index
    %33 = memref.load %arg1[%c4] : memref<36xf32, #tpu.memory_space<smem>>
    %34 = vector.extract_strided_slice %27 {offsets = [1, 0], sizes = [16, 36], strides = [1, 1]} : vector<18x36xf32> to vector<16x36xf32>
    %35 = vector.broadcast %33 : f32 to vector<16x36xf32>
    %36 = arith.mulf %35, %34 : vector<16x36xf32>
    %37 = arith.addf %32, %36 : vector<16x36xf32>
    %c7 = arith.constant 7 : index
    %38 = memref.load %arg1[%c7] : memref<36xf32, #tpu.memory_space<smem>>
    %39 = vector.extract_strided_slice %27 {offsets = [2, 0], sizes = [16, 36], strides = [1, 1]} : vector<18x36xf32> to vector<16x36xf32>
    %40 = vector.broadcast %38 : f32 to vector<16x36xf32>
    %41 = arith.mulf %40, %39 : vector<16x36xf32>
    %42 = arith.addf %37, %41 : vector<16x36xf32>
    %43 = vector.extract_strided_slice %10 {offsets = [0, 2], sizes = [18, 36], strides = [1, 1]} : vector<18x38xf32> to vector<18x36xf32>
    %c2 = arith.constant 2 : index
    %44 = memref.load %arg1[%c2] : memref<36xf32, #tpu.memory_space<smem>>
    %45 = vector.extract_strided_slice %43 {offsets = [0, 0], sizes = [16, 36], strides = [1, 1]} : vector<18x36xf32> to vector<16x36xf32>
    %46 = vector.broadcast %44 : f32 to vector<16x36xf32>
    %47 = arith.mulf %46, %45 : vector<16x36xf32>
    %48 = arith.addf %42, %47 : vector<16x36xf32>
    %c5 = arith.constant 5 : index
    %49 = memref.load %arg1[%c5] : memref<36xf32, #tpu.memory_space<smem>>
    %50 = vector.extract_strided_slice %43 {offsets = [1, 0], sizes = [16, 36], strides = [1, 1]} : vector<18x36xf32> to vector<16x36xf32>
    %51 = vector.broadcast %49 : f32 to vector<16x36xf32>
    %52 = arith.mulf %51, %50 : vector<16x36xf32>
    %53 = arith.addf %48, %52 : vector<16x36xf32>
    %c8 = arith.constant 8 : index
    %54 = memref.load %arg1[%c8] : memref<36xf32, #tpu.memory_space<smem>>
    %55 = vector.extract_strided_slice %43 {offsets = [2, 0], sizes = [16, 36], strides = [1, 1]} : vector<18x36xf32> to vector<16x36xf32>
    %56 = vector.broadcast %54 : f32 to vector<16x36xf32>
    %57 = arith.mulf %56, %55 : vector<16x36xf32>
    %58 = arith.addf %53, %57 : vector<16x36xf32>
    %c1_20 = arith.constant 1 : index
    %c0_21 = arith.constant 0 : index
    %c0_22 = arith.constant 0 : index
    %59 = vector.load %arg4[%c1_20, %c0_21, %c0_22] : memref<4x18x38xf32, #tpu.memory_space<vmem>>, vector<1x18x38xf32>
    %60 = vector.shape_cast %59 : vector<1x18x38xf32> to vector<18x38xf32>
    %61 = vector.extract_strided_slice %60 {offsets = [0, 0], sizes = [18, 36], strides = [1, 1]} : vector<18x38xf32> to vector<18x36xf32>
    %c9 = arith.constant 9 : index
    %62 = memref.load %arg1[%c9] : memref<36xf32, #tpu.memory_space<smem>>
    %63 = vector.extract_strided_slice %61 {offsets = [0, 0], sizes = [16, 36], strides = [1, 1]} : vector<18x36xf32> to vector<16x36xf32>
    %64 = vector.broadcast %62 : f32 to vector<16x36xf32>
    %65 = arith.mulf %64, %63 : vector<16x36xf32>
    %66 = arith.addf %58, %65 : vector<16x36xf32>
    %c12 = arith.constant 12 : index
    %67 = memref.load %arg1[%c12] : memref<36xf32, #tpu.memory_space<smem>>
    %68 = vector.extract_strided_slice %61 {offsets = [1, 0], sizes = [16, 36], strides = [1, 1]} : vector<18x36xf32> to vector<16x36xf32>
    %69 = vector.broadcast %67 : f32 to vector<16x36xf32>
    %70 = arith.mulf %69, %68 : vector<16x36xf32>
    %71 = arith.addf %66, %70 : vector<16x36xf32>
    %c15 = arith.constant 15 : index
    %72 = memref.load %arg1[%c15] : memref<36xf32, #tpu.memory_space<smem>>
    %73 = vector.extract_strided_slice %61 {offsets = [2, 0], sizes = [16, 36], strides = [1, 1]} : vector<18x36xf32> to vector<16x36xf32>
    %74 = vector.broadcast %72 : f32 to vector<16x36xf32>
    %75 = arith.mulf %74, %73 : vector<16x36xf32>
    %76 = arith.addf %71, %75 : vector<16x36xf32>
    %77 = vector.extract_strided_slice %60 {offsets = [0, 1], sizes = [18, 36], strides = [1, 1]} : vector<18x38xf32> to vector<18x36xf32>
    %c10 = arith.constant 10 : index
    %78 = memref.load %arg1[%c10] : memref<36xf32, #tpu.memory_space<smem>>
    %79 = vector.extract_strided_slice %77 {offsets = [0, 0], sizes = [16, 36], strides = [1, 1]} : vector<18x36xf32> to vector<16x36xf32>
    %80 = vector.broadcast %78 : f32 to vector<16x36xf32>
    %81 = arith.mulf %80, %79 : vector<16x36xf32>
    %82 = arith.addf %76, %81 : vector<16x36xf32>
    %c13 = arith.constant 13 : index
    %83 = memref.load %arg1[%c13] : memref<36xf32, #tpu.memory_space<smem>>
    %84 = vector.extract_strided_slice %77 {offsets = [1, 0], sizes = [16, 36], strides = [1, 1]} : vector<18x36xf32> to vector<16x36xf32>
    %85 = vector.broadcast %83 : f32 to vector<16x36xf32>
    %86 = arith.mulf %85, %84 : vector<16x36xf32>
    %87 = arith.addf %82, %86 : vector<16x36xf32>
    %c16 = arith.constant 16 : index
    %88 = memref.load %arg1[%c16] : memref<36xf32, #tpu.memory_space<smem>>
    %89 = vector.extract_strided_slice %77 {offsets = [2, 0], sizes = [16, 36], strides = [1, 1]} : vector<18x36xf32> to vector<16x36xf32>
    %90 = vector.broadcast %88 : f32 to vector<16x36xf32>
    %91 = arith.mulf %90, %89 : vector<16x36xf32>
    %92 = arith.addf %87, %91 : vector<16x36xf32>
    %93 = vector.extract_strided_slice %60 {offsets = [0, 2], sizes = [18, 36], strides = [1, 1]} : vector<18x38xf32> to vector<18x36xf32>
    %c11 = arith.constant 11 : index
    %94 = memref.load %arg1[%c11] : memref<36xf32, #tpu.memory_space<smem>>
    %95 = vector.extract_strided_slice %93 {offsets = [0, 0], sizes = [16, 36], strides = [1, 1]} : vector<18x36xf32> to vector<16x36xf32>
    %96 = vector.broadcast %94 : f32 to vector<16x36xf32>
    %97 = arith.mulf %96, %95 : vector<16x36xf32>
    %98 = arith.addf %92, %97 : vector<16x36xf32>
    %c14 = arith.constant 14 : index
    %99 = memref.load %arg1[%c14] : memref<36xf32, #tpu.memory_space<smem>>
    %100 = vector.extract_strided_slice %93 {offsets = [1, 0], sizes = [16, 36], strides = [1, 1]} : vector<18x36xf32> to vector<16x36xf32>
    %101 = vector.broadcast %99 : f32 to vector<16x36xf32>
    %102 = arith.mulf %101, %100 : vector<16x36xf32>
    %103 = arith.addf %98, %102 : vector<16x36xf32>
    %c17 = arith.constant 17 : index
    %104 = memref.load %arg1[%c17] : memref<36xf32, #tpu.memory_space<smem>>
    %105 = vector.extract_strided_slice %93 {offsets = [2, 0], sizes = [16, 36], strides = [1, 1]} : vector<18x36xf32> to vector<16x36xf32>
    %106 = vector.broadcast %104 : f32 to vector<16x36xf32>
    %107 = arith.mulf %106, %105 : vector<16x36xf32>
    %108 = arith.addf %103, %107 : vector<16x36xf32>
    %c2_23 = arith.constant 2 : index
    %c0_24 = arith.constant 0 : index
    %c0_25 = arith.constant 0 : index
    %109 = vector.load %arg4[%c2_23, %c0_24, %c0_25] : memref<4x18x38xf32, #tpu.memory_space<vmem>>, vector<1x18x38xf32>
    %110 = vector.shape_cast %109 : vector<1x18x38xf32> to vector<18x38xf32>
    %111 = vector.extract_strided_slice %110 {offsets = [0, 0], sizes = [18, 36], strides = [1, 1]} : vector<18x38xf32> to vector<18x36xf32>
    %c18 = arith.constant 18 : index
    %112 = memref.load %arg1[%c18] : memref<36xf32, #tpu.memory_space<smem>>
    %113 = vector.extract_strided_slice %111 {offsets = [0, 0], sizes = [16, 36], strides = [1, 1]} : vector<18x36xf32> to vector<16x36xf32>
    %114 = vector.broadcast %112 : f32 to vector<16x36xf32>
    %115 = arith.mulf %114, %113 : vector<16x36xf32>
    %116 = arith.addf %108, %115 : vector<16x36xf32>
    %c21 = arith.constant 21 : index
    %117 = memref.load %arg1[%c21] : memref<36xf32, #tpu.memory_space<smem>>
    %118 = vector.extract_strided_slice %111 {offsets = [1, 0], sizes = [16, 36], strides = [1, 1]} : vector<18x36xf32> to vector<16x36xf32>
    %119 = vector.broadcast %117 : f32 to vector<16x36xf32>
    %120 = arith.mulf %119, %118 : vector<16x36xf32>
    %121 = arith.addf %116, %120 : vector<16x36xf32>
    %c24 = arith.constant 24 : index
    %122 = memref.load %arg1[%c24] : memref<36xf32, #tpu.memory_space<smem>>
    %123 = vector.extract_strided_slice %111 {offsets = [2, 0], sizes = [16, 36], strides = [1, 1]} : vector<18x36xf32> to vector<16x36xf32>
    %124 = vector.broadcast %122 : f32 to vector<16x36xf32>
    %125 = arith.mulf %124, %123 : vector<16x36xf32>
    %126 = arith.addf %121, %125 : vector<16x36xf32>
    %127 = vector.extract_strided_slice %110 {offsets = [0, 1], sizes = [18, 36], strides = [1, 1]} : vector<18x38xf32> to vector<18x36xf32>
    %c19_26 = arith.constant 19 : index
    %128 = memref.load %arg1[%c19_26] : memref<36xf32, #tpu.memory_space<smem>>
    %129 = vector.extract_strided_slice %127 {offsets = [0, 0], sizes = [16, 36], strides = [1, 1]} : vector<18x36xf32> to vector<16x36xf32>
    %130 = vector.broadcast %128 : f32 to vector<16x36xf32>
    %131 = arith.mulf %130, %129 : vector<16x36xf32>
    %132 = arith.addf %126, %131 : vector<16x36xf32>
    %c22 = arith.constant 22 : index
    %133 = memref.load %arg1[%c22] : memref<36xf32, #tpu.memory_space<smem>>
    %134 = vector.extract_strided_slice %127 {offsets = [1, 0], sizes = [16, 36], strides = [1, 1]} : vector<18x36xf32> to vector<16x36xf32>
    %135 = vector.broadcast %133 : f32 to vector<16x36xf32>
    %136 = arith.mulf %135, %134 : vector<16x36xf32>
    %137 = arith.addf %132, %136 : vector<16x36xf32>
    %c25 = arith.constant 25 : index
    %138 = memref.load %arg1[%c25] : memref<36xf32, #tpu.memory_space<smem>>
    %139 = vector.extract_strided_slice %127 {offsets = [2, 0], sizes = [16, 36], strides = [1, 1]} : vector<18x36xf32> to vector<16x36xf32>
    %140 = vector.broadcast %138 : f32 to vector<16x36xf32>
    %141 = arith.mulf %140, %139 : vector<16x36xf32>
    %142 = arith.addf %137, %141 : vector<16x36xf32>
    %143 = vector.extract_strided_slice %110 {offsets = [0, 2], sizes = [18, 36], strides = [1, 1]} : vector<18x38xf32> to vector<18x36xf32>
    %c20 = arith.constant 20 : index
    %144 = memref.load %arg1[%c20] : memref<36xf32, #tpu.memory_space<smem>>
    %145 = vector.extract_strided_slice %143 {offsets = [0, 0], sizes = [16, 36], strides = [1, 1]} : vector<18x36xf32> to vector<16x36xf32>
    %146 = vector.broadcast %144 : f32 to vector<16x36xf32>
    %147 = arith.mulf %146, %145 : vector<16x36xf32>
    %148 = arith.addf %142, %147 : vector<16x36xf32>
    %c23 = arith.constant 23 : index
    %149 = memref.load %arg1[%c23] : memref<36xf32, #tpu.memory_space<smem>>
    %150 = vector.extract_strided_slice %143 {offsets = [1, 0], sizes = [16, 36], strides = [1, 1]} : vector<18x36xf32> to vector<16x36xf32>
    %151 = vector.broadcast %149 : f32 to vector<16x36xf32>
    %152 = arith.mulf %151, %150 : vector<16x36xf32>
    %153 = arith.addf %148, %152 : vector<16x36xf32>
    %c26 = arith.constant 26 : index
    %154 = memref.load %arg1[%c26] : memref<36xf32, #tpu.memory_space<smem>>
    %155 = vector.extract_strided_slice %143 {offsets = [2, 0], sizes = [16, 36], strides = [1, 1]} : vector<18x36xf32> to vector<16x36xf32>
    %156 = vector.broadcast %154 : f32 to vector<16x36xf32>
    %157 = arith.mulf %156, %155 : vector<16x36xf32>
    %158 = arith.addf %153, %157 : vector<16x36xf32>
    %c3_27 = arith.constant 3 : index
    %c0_28 = arith.constant 0 : index
    %c0_29 = arith.constant 0 : index
    %159 = vector.load %arg4[%c3_27, %c0_28, %c0_29] : memref<4x18x38xf32, #tpu.memory_space<vmem>>, vector<1x18x38xf32>
    %160 = vector.shape_cast %159 : vector<1x18x38xf32> to vector<18x38xf32>
    %161 = vector.extract_strided_slice %160 {offsets = [0, 0], sizes = [18, 36], strides = [1, 1]} : vector<18x38xf32> to vector<18x36xf32>
    %c27 = arith.constant 27 : index
    %162 = memref.load %arg1[%c27] : memref<36xf32, #tpu.memory_space<smem>>
    %163 = vector.extract_strided_slice %161 {offsets = [0, 0], sizes = [16, 36], strides = [1, 1]} : vector<18x36xf32> to vector<16x36xf32>
    %164 = vector.broadcast %162 : f32 to vector<16x36xf32>
    %165 = arith.mulf %164, %163 : vector<16x36xf32>
    %166 = arith.addf %158, %165 : vector<16x36xf32>
    %c30 = arith.constant 30 : index
    %167 = memref.load %arg1[%c30] : memref<36xf32, #tpu.memory_space<smem>>
    %168 = vector.extract_strided_slice %161 {offsets = [1, 0], sizes = [16, 36], strides = [1, 1]} : vector<18x36xf32> to vector<16x36xf32>
    %169 = vector.broadcast %167 : f32 to vector<16x36xf32>
    %170 = arith.mulf %169, %168 : vector<16x36xf32>
    %171 = arith.addf %166, %170 : vector<16x36xf32>
    %c33 = arith.constant 33 : index
    %172 = memref.load %arg1[%c33] : memref<36xf32, #tpu.memory_space<smem>>
    %173 = vector.extract_strided_slice %161 {offsets = [2, 0], sizes = [16, 36], strides = [1, 1]} : vector<18x36xf32> to vector<16x36xf32>
    %174 = vector.broadcast %172 : f32 to vector<16x36xf32>
    %175 = arith.mulf %174, %173 : vector<16x36xf32>
    %176 = arith.addf %171, %175 : vector<16x36xf32>
    %177 = vector.extract_strided_slice %160 {offsets = [0, 1], sizes = [18, 36], strides = [1, 1]} : vector<18x38xf32> to vector<18x36xf32>
    %c28 = arith.constant 28 : index
    %178 = memref.load %arg1[%c28] : memref<36xf32, #tpu.memory_space<smem>>
    %179 = vector.extract_strided_slice %177 {offsets = [0, 0], sizes = [16, 36], strides = [1, 1]} : vector<18x36xf32> to vector<16x36xf32>
    %180 = vector.broadcast %178 : f32 to vector<16x36xf32>
    %181 = arith.mulf %180, %179 : vector<16x36xf32>
    %182 = arith.addf %176, %181 : vector<16x36xf32>
    %c31 = arith.constant 31 : index
    %183 = memref.load %arg1[%c31] : memref<36xf32, #tpu.memory_space<smem>>
    %184 = vector.extract_strided_slice %177 {offsets = [1, 0], sizes = [16, 36], strides = [1, 1]} : vector<18x36xf32> to vector<16x36xf32>
    %185 = vector.broadcast %183 : f32 to vector<16x36xf32>
    %186 = arith.mulf %185, %184 : vector<16x36xf32>
    %187 = arith.addf %182, %186 : vector<16x36xf32>
    %c34 = arith.constant 34 : index
    %188 = memref.load %arg1[%c34] : memref<36xf32, #tpu.memory_space<smem>>
    %189 = vector.extract_strided_slice %177 {offsets = [2, 0], sizes = [16, 36], strides = [1, 1]} : vector<18x36xf32> to vector<16x36xf32>
    %190 = vector.broadcast %188 : f32 to vector<16x36xf32>
    %191 = arith.mulf %190, %189 : vector<16x36xf32>
    %192 = arith.addf %187, %191 : vector<16x36xf32>
    %193 = vector.extract_strided_slice %160 {offsets = [0, 2], sizes = [18, 36], strides = [1, 1]} : vector<18x38xf32> to vector<18x36xf32>
    %c29 = arith.constant 29 : index
    %194 = memref.load %arg1[%c29] : memref<36xf32, #tpu.memory_space<smem>>
    %195 = vector.extract_strided_slice %193 {offsets = [0, 0], sizes = [16, 36], strides = [1, 1]} : vector<18x36xf32> to vector<16x36xf32>
    %196 = vector.broadcast %194 : f32 to vector<16x36xf32>
    %197 = arith.mulf %196, %195 : vector<16x36xf32>
    %198 = arith.addf %192, %197 : vector<16x36xf32>
    %c32 = arith.constant 32 : index
    %199 = memref.load %arg1[%c32] : memref<36xf32, #tpu.memory_space<smem>>
    %200 = vector.extract_strided_slice %193 {offsets = [1, 0], sizes = [16, 36], strides = [1, 1]} : vector<18x36xf32> to vector<16x36xf32>
    %201 = vector.broadcast %199 : f32 to vector<16x36xf32>
    %202 = arith.mulf %201, %200 : vector<16x36xf32>
    %203 = arith.addf %198, %202 : vector<16x36xf32>
    %c35 = arith.constant 35 : index
    %204 = memref.load %arg1[%c35] : memref<36xf32, #tpu.memory_space<smem>>
    %205 = vector.extract_strided_slice %193 {offsets = [2, 0], sizes = [16, 36], strides = [1, 1]} : vector<18x36xf32> to vector<16x36xf32>
    %206 = vector.broadcast %204 : f32 to vector<16x36xf32>
    %207 = arith.mulf %206, %205 : vector<16x36xf32>
    %208 = arith.addf %203, %207 : vector<16x36xf32>
    %c0_30 = arith.constant 0 : index
    %c0_31 = arith.constant 0 : index
    %c0_32 = arith.constant 0 : index
    %209 = vector.load %arg3[%c0_30, %c0_31, %c0_32] : memref<1x16x36xf32, #tpu.memory_space<vmem>>, vector<1x16x36xf32>
    %210 = vector.shape_cast %209 : vector<1x16x36xf32> to vector<16x36xf32>
    %211 = vector.shape_cast %208 : vector<16x36xf32> to vector<1x16x36xf32>
    tpu.vector_store %arg3[%c0_30, %c0_31, %c0_32], %211 {strides = array<i32>} : memref<1x16x36xf32, #tpu.memory_space<vmem>>, vector<1x16x36xf32>,
    return
  }
  func.func @transform_0(%arg0: i32) -> i32 {
    %c0_i32 = arith.constant 0 : i32
    %c0_i32_0 = arith.constant 0 : i32
    return %c0_i32 : i32
  }
  func.func @transform_1(%arg0: i32) -> (i32, i32, i32, i32) {
    %c0_i32 = arith.constant 0 : i32
    %c0_i32_0 = arith.constant 0 : i32
    %c0_i32_1 = arith.constant 0 : i32
    %c0_i32_2 = arith.constant 0 : i32
    return %arg0, %c0_i32, %c0_i32_0, %c0_i32_1 : i32, i32, i32, i32
  }
  func.func @transform_2(%arg0: i32) -> (i32, i32, i32) {
    %c0_i32 = arith.constant 0 : i32
    %c0_i32_0 = arith.constant 0 : i32
    %c0_i32_1 = arith.constant 0 : i32
    return %arg0, %c0_i32, %c0_i32_0 : i32, i32, i32
  }
}

</mosaic_0001>

<bundles_post_ra>
// kernel: tpu_custom_call.1
= control target key start
LH: loop header
LB: loop body
LE: loop exit
PB: predicated region body
PF: predicated region fallthrough
CT: control target
= control target key end

     0   :  { %7 = vsyncpa [#allocation6], 0  ;;  %s1412_s0 = inlined_call_operand.hbm [shape: f32[36], index: 0, kind: input, shape index: {}]   ;;  %s1413_s1 = inlined_call_operand.hbm [shape: f32[2,4,16,16], index: 1, kind: input, shape index: {}]   ;;  %s1414_s2 = inlined_call_operand.hbm [shape: f32[1,16,36], index: 2, kind: output, shape index: {}]  }
   0x1   :  { %8 = vsyncpa [#allocation4], 0 }
   0x2   :  { %9 = vsyncpa [#allocation5], 0  ;;  %s895_s9 = smov [#allocation3]   ;;  %s896_s12 = smov [#allocation7]  }
   0x3   :  { %17 = dma.hbm_to_smem %s1412_s0, 16, %s895_s9, [#allocation6]  }
   0x4   :  { %s23_s13 = sshll.u32 %s896_s12, 4  ;;  %s24_s13 = int_to_ptr.vmem [resolvable:$true] %s23_s13 }
   0x5   :  { %s857_s14 = scalar_lea.vmem %s24_s13, 2048  ;;  %p862_p1 = scmp.lt.s32.totalorder %s24_s13, %s24_s13 }
   0x6   :  { %p858_p0 = scmp.ne.s32.totalorder %s24_s13, %s857_s14  ;;  %p863_p2 = scmp.lt.s32.totalorder %s857_s14, %s857_s14 }
   0x8   :  { %p864_p3 = por %p863_p2, %p862_p1 }
   0xa   :  { %p865_p4 = pnand %p864_p3, %p858_p0 }
   0xc   :  { %868 = shalt.err (!%p865_p4)
}
   0xd   :  { %s897_s15 = smov 128   ;;  %s898_s16 = smov 8  }
   0xe   :  { %29 = dma.hbm_to_vmem [thread:$0]  %s1413_s1, 2048, %s24_s13, [#allocation4], %s897_s15, %s897_s15, %s898_s16  }
   0xf   :  { %889 = dma.done.wait [#allocation6], 16  }
  0x10   :  { %890 = vsyncadd [#allocation6], 4294967280 }
  0x11   :  { %891 = dma.done.wait [#allocation4], 2048  }
  0x12   :  { %892 = vsyncadd [#allocation4], 4294965248 }
  0x13   :  { %36 = sfence }
  0x14   :  { %v51_v0 = vld [vmem:[#allocation7] sm:$0xff]  ;;  %s899_s0 = smov 1   ;;  %s900_s19 = smov 19   ;;  %vm37_vm0 = vcmask 310272   ;;  %v52_v2 = vld [vmem:[#allocation7 + $0x8] sm:$0xff]  ;;  %v901_v4 = vmov 0.0  }
  0x15   :  { %v101_v1 = vld [vmem:[#allocation7 + $0x40] sm:$0xff]  ;;  %67 = vrot.lane.b32.xlu0 %v51_v0, %s899_s0  ;;  %v102_v3 = vld [vmem:[#allocation7 + $0x48] sm:$0xff]  ;;  %38 = vst.msk [vmem:[#allocation2] sm:$0xff] %vm37_vm0, %v901_v4  ;;  %39 = vst.msk [vmem:[#allocation2 + $0x8] sm:$0xff] %vm37_vm0, %v901_v4  ;;  %vm40_vm1 = vcmask 304128   ;;  %vm91_vm2 = vcmask 138248  }
  0x16   :  { %117 = vrot.lane.b32.xlu1 %v101_v1, %s900_s19  ;;  %42 = vst.msk [vmem:[#allocation2 + $0x18] sm:$0xff] %vm37_vm0, %v901_v4  ;;  %43 = vst.msk [vmem:[#allocation2 + $0x20] sm:$0xff] %vm37_vm0, %v901_v4  ;;  %v53_v5 = vld [vmem:[#allocation7 + $0x10] sm:$0xff]  ;;  %v54_v6 = vld [vmem:[#allocation7 + $0x18] sm:$0xff]  ;;  %vm141_vm3 = vcmask 285848   ;;  %s945_s1 = sld [smem:[#allocation3 + $0x1]] }
  0x17   :  { %45 = vst.msk [vmem:[#allocation2 + $0x30] sm:$0xff] %vm37_vm0, %v901_v4  ;;  %46 = vst.msk [vmem:[#allocation2 + $0x38] sm:$0xff] %vm37_vm0, %v901_v4  ;;  %v103_v7 = vld [vmem:[#allocation7 + $0x50] sm:$0xff]  ;;  %v104_v8 = vld [vmem:[#allocation7 + $0x58] sm:$0xff]  ;;  %s949_s20 = sld [smem:[#allocation3 + $0x2]]  ;;  %s902_s29 = smov 127  }
  0x18   :  { %48 = vst.msk [vmem:[#allocation2 + $0x48] sm:$0xff] %vm37_vm0, %v901_v4  ;;  %49 = vst.msk [vmem:[#allocation2 + $0x50] sm:$0xff] %vm37_vm0, %v901_v4  ;;  %v55_v9 = vld [vmem:[#allocation7 + $0x20] sm:$0xff]  ;;  %v56_v10 = vld [vmem:[#allocation7 + $0x28] sm:$0xff]  ;;  %s951_s21 = sld [smem:[#allocation3 + $0xa]]  ;;  %s903_s6 = smov 126  }
  0x19   :  { %41 = vst.msk [vmem:[#allocation2 + $0x10] sm:$0x3] %vm40_vm1, %v901_v4  ;;  %44 = vst.msk [vmem:[#allocation2 + $0x28] sm:$0x3] %vm40_vm1, %v901_v4  ;;  %69 = vrot.lane.b32.xlu0 %v52_v2, %s899_s0  ;;  %v105_v11 = vld [vmem:[#allocation7 + $0x60] sm:$0xff]  ;;  %v106_v12 = vld [vmem:[#allocation7 + $0x68] sm:$0xff] }
  0x1a   :  { %47 = vst.msk [vmem:[#allocation2 + $0x40] sm:$0x3] %vm40_vm1, %v901_v4  ;;  %50 = vst.msk [vmem:[#allocation2 + $0x58] sm:$0x3] %vm40_vm1, %v901_v4  ;;  %119 = vrot.lane.b32.xlu1 %v102_v3, %s900_s19  ;;  %v57_v13 = vld [vmem:[#allocation7 + $0x30] sm:$0xff]  ;;  %v58_v14 = vld [vmem:[#allocation7 + $0x38] sm:$0xff] }
  0x1b   :  { %v107_v15 = vld [vmem:[#allocation7 + $0x70] sm:$0xff]  ;;  %v108_v16 = vld [vmem:[#allocation7 + $0x78] sm:$0xff]  ;;  %s954_s22 = sld [smem:[#allocation3 + $0xb]]  ;;  %vm167_vm4 = vcmask 1046528   ;;  %vm185_vm5 = vcmask 1045504   ;;  %vm775_vm6 = vcmask 293888  }
  0x1c   :  { %s957_s23 = sld [smem:[#allocation3 + $0x4]]  ;;  %v196_v21 = vstv %s945_s1 }
  0x1d   :  { %71 = vrot.lane.b32.xlu0 %v53_v5, %s899_s0  ;;  %s960_s24 = sld [smem:[#allocation3 + $0x7]]  ;;  %v252_v26 = vstv %s949_s20 }
  0x1e   :  { %73 = vrot.lane.b32.xlu1 %v54_v6, %s899_s0  ;;  %s962_s25 = sld [smem:[#allocation3 + $0x5]]  ;;  %v352_v35 = vstv %s951_s21 }
  0x1f   :  { %s968_s26 = sld [smem:[#allocation3 + $0x13]] }
  0x20   :  { %s971_s27 = sld [smem:[#allocation3 + $0x14]] }
  0x21   :  { %121 = vrot.lane.b32.xlu0 %v103_v7, %s900_s19  ;;  %s974_s28 = sld [smem:[#allocation3 + $0x8]]  ;;  %v408_v42 = vstv %s954_s22 }
  0x22   :  { %123 = vrot.lane.b32.xlu1 %v104_v8, %s900_s19  ;;  %s977_s30 = sld [smem:[#allocation3 + $0xd]]  ;;  %v210_v48 = vstv %s957_s23 }
  0x23   :  { %s983_s3 = sld [smem:[#allocation3 + $0x10]]  ;;  %v231_v49 = vstv %s960_s24 }
  0x24   :  { %s987_s4 = sld [smem:[#allocation3 + $0xe]]  ;;  %v266_v50 = vstv %s962_s25 }
  0x25   :  { %75 = vrot.lane.b32.xlu0 %v55_v9, %s899_s0  ;;  %s989_s5 = sld [smem:[#allocation3 + $0x11]]  ;;  %v508_v47 = vstv %s968_s26 }
  0x26   :  { %77 = vrot.lane.b32.xlu1 %v56_v10, %s899_s0  ;;  %s993_s7 = sld [smem:[#allocation3 + $0x16]]  ;;  %v564_v53 = vstv %s971_s27 }
  0x27   :  { %s997_s8 = sld [smem:[#allocation3]]  ;;  %v287_v57 = vstv %s974_s28 }
  0x28   :  { %s1001_s9 = sld [smem:[#allocation3 + $0x3]]  ;;  %v366_v58 = vstv %s977_s30 }
  0x29   :  { %125 = vrot.lane.b32.xlu0 %v105_v11, %s900_s19  ;;  %s1003_s10 = sld [smem:[#allocation3 + $0x6]]  ;;  %v387_v61 = vstv %s983_s3 }
  0x2a   :  { %127 = vrot.lane.b32.xlu1 %v106_v12, %s900_s19  ;;  %s1010_s11 = sld [smem:[#allocation3 + $0x1c]]  ;;  %v1056_v62 = vstv %s987_s4 }
  0x2b   :  { %s1016_s12 = sld [smem:[#allocation3 + $0xc]]  ;;  %v1060_v0 = vstv %s989_s5 }
  0x2c   :  { %s1019_s13 = sld [smem:[#allocation3 + $0xf]]  ;;  %v1063_v1 = vstv %s993_s7 }
  0x2d   :  { %79 = vrot.lane.b32.xlu0 %v57_v13, %s899_s0  ;;  %s1022_s14 = sld [smem:[#allocation3 + $0x15]]  ;;  %v154_v2 = vstv %s997_s8 }
  0x2e   :  { %81 = vrot.lane.b32.xlu1 %v58_v14, %s899_s0  ;;  %s1025_s17 = sld [smem:[#allocation3 + $0x18]]  ;;  %v160_v5 = vstv %s1001_s9 }
  0x2f   :  { %s1030_s18 = sld [smem:[#allocation3 + $0x1e]]  ;;  %v1071_v6 = vstv %s1003_s10 }
  0x30   :  { %s1048_s0 = sld [smem:[#allocation3 + $0x21]]  ;;  %v664_v4 = vstv %s1010_s11 }
  0x31   :  { %129 = vrot.lane.b32.xlu0 %v107_v15, %s900_s19  ;;  %v1076_v8 = vstv %s1016_s12  ;;  %s1266_s1 = sld [smem:[#allocation3 + $0x17]] }
  0x32   :  { %131 = vrot.lane.b32.xlu1 %v108_v16, %s900_s19  ;;  %v1079_v9 = vstv %s1019_s13  ;;  %s1215_s19 = sld [smem:[#allocation3 + $0x19]] }
  0x33   :  { %v1082_v10 = vstv %s1022_s14  ;;  %s821_s20 = sld [smem:[#allocation3 + $0x1a]] }
  0x34   :  { %v1087_v13 = vstv %s1025_s17  ;;  %s826_s21 = sld [smem:[#allocation3 + $0x1f]] }
  0x35   :  { %v1090_v14 = vstv %s1030_s18  ;;  %s1319_s22 = sld [smem:[#allocation3 + $0x1d]] }
  0x36   :  { %s827_s23 = sld [smem:[#allocation3 + $0x22]] }
  0x37   :  { %s829_s24 = sld [smem:[#allocation3 + $0x20]] }
  0x38   :  { %s830_s25 = sld [smem:[#allocation3 + $0x23]] }
  0x39   :  { %s804_s26 = sld [smem:[#allocation3 + $0x9]] }
  0x3a   :  { %s813_s27 = sld [smem:[#allocation3 + $0x12]] }
  0x3b   :  { %s822_s28 = sld [smem:[#allocation3 + $0x1b]] }
  0x87   :  { %v68_v17 = vpop.permute.xlu0 %67 }
  0x88   :  { %v118_v18 = vpop.permute.xlu1 %117  ;;  %92 = vst.msk [vmem:[#allocation2 + $0x1] sm:$0xff] %vm91_vm2, %v68_v17 }
  0x89   :  { %142 = vst.msk [vmem:[#allocation2 + $0x1] sm:$0xff] %vm141_vm3, %v118_v18 }
  0x8b   :  { %v70_v19 = vpop.permute.xlu0 %69 }
  0x8c   :  { %v120_v20 = vpop.permute.xlu1 %119  ;;  %93 = vst.msk [vmem:[#allocation2 + $0x9] sm:$0xff] %vm91_vm2, %v70_v19 }
  0x8d   :  { %143 = vst.msk [vmem:[#allocation2 + $0x9] sm:$0xff] %vm141_vm3, %v120_v20 }
  0x8f   :  { %v72_v22 = vpop.permute.xlu0 %71 }
  0x90   :  { %v74_v23 = vpop.permute.xlu1 %73  ;;  %94 = vst.msk [vmem:[#allocation2 + $0x19] sm:$0xff] %vm91_vm2, %v72_v22  ;;  %v966_v24 = vld [vmem:[#allocation2] sm:$0xff] }
  0x91   :  { %95 = vst.msk [vmem:[#allocation2 + $0x21] sm:$0xff] %vm91_vm2, %v74_v23  ;;  %v197_v25 = vmul.f32 %v196_v21, %v966_v24  ;;  %v253_v31 = vmul.f32 %v252_v26, %v966_v24  ;;  %v211_v7 = vmul.f32 %v210_v48, %v966_v24  ;;  %v232_v17 = vmul.f32 %v231_v49, %v966_v24 }
  0x92   :  { %v267_v18 = vmul.f32 %v266_v50, %v966_v24  ;;  %v161_v22 = vmul.f32 %v160_v5, %v966_v24 }
  0x93   :  { %v122_v27 = vpop.permute.xlu0 %121  ;;  %201 = vrot.lane.b32.xlu0 %v197_v25, %s902_s29  ;;  %v217_v23 = vrot.slane %v211_v7, 1 }
  0x94   :  { %v124_v28 = vpop.permute.xlu1 %123  ;;  %144 = vst.msk [vmem:[#allocation2 + $0x19] sm:$0xff] %vm141_vm3, %v122_v27  ;;  %v981_v29 = vld [vmem:[#allocation2 + $0x8] sm:$0xff]  ;;  %v1044_v54 = vld [vmem:[#allocation2 + $0x10] sm:$0x3]  ;;  %v1105_v27 = vstv %s1048_s0 }
  0x95   :  { %145 = vst.msk [vmem:[#allocation2 + $0x21] sm:$0xff] %vm141_vm3, %v124_v28  ;;  %v198_v30 = vmul.f32 %v196_v21, %v981_v29  ;;  %v254_v34 = vmul.f32 %v252_v26, %v981_v29  ;;  %v212_v63 = vmul.f32 %v210_v48, %v981_v29  ;;  %v213_v3 = vmul.f32 %v210_v48, %v1044_v54 }
  0x96   :  { %v233_v12 = vmul.f32 %v231_v49, %v981_v29  ;;  %v234_v20 = vmul.f32 %v231_v49, %v1044_v54  ;;  %v288_v21 = vmul.f32 %v287_v57, %v966_v24  ;;  %v268_v25 = vmul.f32 %v266_v50, %v981_v29 }
  0x97   :  { %v76_v32 = vpop.permute.xlu0 %75  ;;  %203 = vrot.lane.b32.xlu1 %v198_v30, %s902_s29  ;;  %257 = vrot.lane.b32.xlu0 %v253_v31, %s903_s6  ;;  %v218_v16 = vrot.slane %v212_v63, 1  ;;  %v220_v19 = vrot.slane %v213_v3, 1  ;;  %v155_v26 = vmul.f32 %v154_v2, %v966_v24  ;;  %v269_v30 = vmul.f32 %v266_v50, %v1044_v54 }
  0x98   :  { %v78_v33 = vpop.permute.xlu1 %77  ;;  %96 = vst.msk [vmem:[#allocation2 + $0x31] sm:$0xff] %vm91_vm2, %v76_v32  ;;  %v239_v28 = vrot.slane %v233_v12, 2  ;;  %v289_v31 = vmul.f32 %v287_v57, %v981_v29  ;;  %v290_v32 = vmul.f32 %v287_v57, %v1044_v54  ;;  %v162_v57 = vmul.f32 %v160_v5, %v981_v29 }
  0x99   :  { %97 = vst.msk [vmem:[#allocation2 + $0x39] sm:$0xff] %vm91_vm2, %v78_v33  ;;  %v276_v49 = vrot.slane %v269_v30, 1  ;;  %v180_v63 = vmul.f32 %v1071_v6, %v981_v29 }
  0x9a   :  { %v297_v50 = vrot.slane %v290_v32, 2 }
  0x9b   :  { %v126_v36 = vpop.permute.xlu0 %125  ;;  %259 = vrot.lane.b32.xlu1 %v254_v34, %s903_s6  ;;  %v1006_v38 = vld [vmem:[#allocation2 + $0x18] sm:$0xff]  ;;  %v219_v34 = vsel %vm167_vm4, %v217_v23, %v218_v16 }
  0x9c   :  { %v128_v37 = vpop.permute.xlu1 %127  ;;  %v1008_v39 = vld [vmem:[#allocation2 + $0x20] sm:$0xff]  ;;  %146 = vst.msk [vmem:[#allocation2 + $0x31] sm:$0xff] %vm141_vm3, %v126_v36  ;;  %v353_v40 = vmul.f32 %v352_v35, %v1006_v38  ;;  %v409_v45 = vmul.f32 %v408_v42, %v1006_v38  ;;  %v1110_v33 = vld [vmem:[#allocation2 + $0x28] sm:$0x3]  ;;  %v273_v36 = vrot.slane %v267_v18, 1 }
  0x9d   :  { %147 = vst.msk [vmem:[#allocation2 + $0x39] sm:$0xff] %vm141_vm3, %v128_v37  ;;  %v354_v41 = vmul.f32 %v352_v35, %v1008_v39  ;;  %v410_v46 = vmul.f32 %v408_v42, %v1008_v39  ;;  %v238_v35 = vrot.slane %v232_v17, 2  ;;  %v179_v37 = vmul.f32 %v1071_v6, %v966_v24 }
  0x9e   :  { %357 = vrot.lane.b32.xlu0 %v353_v40, %s902_s29  ;;  %v221_v40 = vsel %vm167_vm4, %v218_v16, %v220_v19  ;;  %v294_v42 = vrot.slane %v288_v21, 2  ;;  %v295_v24 = vrot.slane %v289_v31, 2  ;;  %v169_v21 = vrot.slane %v162_v57, 1 }
  0x9f   :  { %359 = vrot.lane.b32.xlu1 %v354_v41, %s902_s29  ;;  %v80_v43 = vpop.permute.xlu0 %79  ;;  %v241_v41 = vrot.slane %v234_v20, 2  ;;  %v240_v48 = vsel %vm185_vm5, %v238_v35, %v239_v28  ;;  %v338_v57 = vmul.f32 %v1079_v9, %v1110_v33 }
  0xa0   :  { %v82_v44 = vpop.permute.xlu1 %81  ;;  %98 = vst.msk [vmem:[#allocation2 + $0x49] sm:$0xff] %vm91_vm2, %v80_v43  ;;  %v168_v43 = vrot.slane %v161_v22, 1  ;;  %v296_v16 = vsel %vm185_vm5, %v294_v42, %v295_v24  ;;  %v298_v17 = vsel %vm185_vm5, %v295_v24, %v297_v50  ;;  %v337_v50 = vmul.f32 %v1079_v9, %v1008_v39 }
  0xa1   :  { %99 = vst.msk [vmem:[#allocation2 + $0x51] sm:$0xff] %vm91_vm2, %v82_v44  ;;  %v274_v44 = vrot.slane %v268_v25, 1  ;;  %v187_v25 = vrot.slane %v180_v63, 2 }
  0xa2   :  { %413 = vrot.lane.b32.xlu0 %v409_v45, %s903_s6  ;;  %v367_v45 = vmul.f32 %v366_v58, %v1006_v38  ;;  %v170_v32 = vsel %vm167_vm4, %v168_v43, %v169_v21  ;;  %v1176_v43 = vmul.f32 %v1060_v0, %v1006_v38  ;;  %v343_v63 = vrot.slane %v337_v50, 2 }
  0xa3   :  { %415 = vrot.lane.b32.xlu1 %v410_v46, %s903_s6  ;;  %v1039_v51 = vld [vmem:[#allocation2 + $0x30] sm:$0xff]  ;;  %v130_v55 = vpop.permute.xlu0 %129  ;;  %v368_v46 = vmul.f32 %v366_v58, %v1008_v39  ;;  %v275_v12 = vsel %vm167_vm4, %v273_v36, %v274_v44  ;;  %v1166_v36 = vmul.f32 %v1056_v62, %v1110_v33 }
  0xa4   :  { %v1041_v52 = vld [vmem:[#allocation2 + $0x38] sm:$0xff]  ;;  %v132_v56 = vpop.permute.xlu1 %131  ;;  %v509_v59 = vmul.f32 %v508_v47, %v1039_v51  ;;  %148 = vst.msk [vmem:[#allocation2 + $0x49] sm:$0xff] %vm141_vm3, %v130_v55  ;;  %v565_v11 = vmul.f32 %v564_v53, %v1039_v51  ;;  %v1126_v55 = vmul.f32 %v387_v61, %v1008_v39 }
  0xa5   :  { %v510_v60 = vmul.f32 %v508_v47, %v1041_v52  ;;  %149 = vst.msk [vmem:[#allocation2 + $0x51] sm:$0xff] %vm141_vm3, %v132_v56  ;;  %v566_v15 = vmul.f32 %v564_v53, %v1041_v52  ;;  %v369_v47 = vmul.f32 %v366_v58, %v1110_v33  ;;  %v1123_v53 = vmul.f32 %v387_v61, %v1006_v38 }
  0xa6   :  { %513 = vrot.lane.b32.xlu0 %v509_v59, %s902_s29  ;;  %v1129_v56 = vmul.f32 %v387_v61, %v1110_v33  ;;  %v242_v58 = vsel %vm185_vm5, %v239_v28, %v241_v41  ;;  %v1136_v59 = vmul.f32 %v1056_v62, %v1006_v38  ;;  %v373_v61 = vrot.slane %v367_v45, 1 }
  0xa7   :  { %515 = vrot.lane.b32.xlu1 %v510_v60, %s902_s29  ;;  %v1140_v60 = vmul.f32 %v1056_v62, %v1008_v39  ;;  %v374_v3 = vrot.slane %v368_v46, 1  ;;  %v376_v7 = vrot.slane %v369_v47, 1  ;;  %v394_v18 = vrot.slane %v1123_v53, 2  ;;  %v1200_v53 = vld [vmem:[#allocation2 + $0x40] sm:$0x3] }
  0xa8   :  { %v395_v19 = vrot.slane %v1126_v55, 2  ;;  %v397_v20 = vrot.slane %v1129_v56, 2  ;;  %v186_v28 = vrot.slane %v179_v37, 2  ;;  %v181_v37 = vmul.f32 %v1071_v6, %v1044_v54 }
  0xa9   :  { %v430_v23 = vrot.slane %v1140_v60, 1  ;;  %v375_v30 = vsel %vm167_vm4, %v373_v61, %v374_v3  ;;  %v377_v31 = vsel %vm167_vm4, %v374_v3, %v376_v7  ;;  %v320_v6 = vmul.f32 %v1076_v8, %v1008_v39 }
  0xaa   :  { %569 = vrot.lane.b32.xlu0 %v565_v11, %s903_s6  ;;  %v163_v11 = vmul.f32 %v160_v5, %v1044_v54  ;;  %v429_v5 = vrot.slane %v1136_v59, 1  ;;  %v188_v41 = vsel %vm185_vm5, %v186_v28, %v187_v25  ;;  %v319_v54 = vmul.f32 %v1076_v8, %v1006_v38 }
  0xab   :  { %571 = vrot.lane.b32.xlu1 %v566_v15, %s903_s6  ;;  %v277_v15 = vsel %vm167_vm4, %v274_v44, %v276_v49  ;;  %v1154_v22 = vld [vmem:[#allocation2 + $0x48] sm:$0xff]  ;;  %v156_v44 = vmul.f32 %v154_v2, %v981_v29  ;;  %v321_v29 = vmul.f32 %v1076_v8, %v1110_v33  ;;  %v336_v2 = vmul.f32 %v1079_v9, %v1006_v38 }
  0xac   :  { %v1162_v35 = vld [vmem:[#allocation2 + $0x50] sm:$0xff]  ;;  %v665_v42 = vmul.f32 %v664_v4, %v1154_v22  ;;  %v325_v49 = vrot.slane %v319_v54, 1  ;;  %v326_v24 = vrot.slane %v320_v6, 1  ;;  %v396_v8 = vsel %vm185_vm5, %v394_v18, %v395_v19  ;;  %v1229_v18 = vld [vmem:[#allocation2 + $0x58] sm:$0x3] }
  0xad   :  { %v666_v46 = vmul.f32 %v664_v4, %v1162_v35  ;;  %v328_v56 = vrot.slane %v321_v29, 1  ;;  %v342_v4 = vrot.slane %v336_v2, 2  ;;  %v475_v61 = vmul.f32 %v1082_v10, %v1039_v51 }
  0xae   :  { %222 = vrot.lane.b32.xlu0 %v219_v34, %s902_s29  ;;  %v171_v34 = vrot.slane %v163_v11, 1  ;;  %v398_v3 = vsel %vm185_vm5, %v395_v19, %v397_v20  ;;  %v345_v9 = vrot.slane %v338_v57, 2  ;;  %v476_v11 = vmul.f32 %v1082_v10, %v1041_v52 }
  0xaf   :  { %224 = vrot.lane.b32.xlu1 %v221_v40, %s902_s29  ;;  %v175_v40 = vadd.f32 %v170_v32, %v155_v26  ;;  %v189_v26 = vrot.slane %v181_v37, 2  ;;  %v1218_v7 = vsel %vm167_vm4, %v326_v24, %v328_v56  ;;  %v648_v6 = vmul.f32 %v1105_v27, %v1154_v22 }
  0xb0   :  { %v172_v45 = vsel %vm167_vm4, %v169_v21, %v171_v34  ;;  %v1232_v19 = vsel %vm185_vm5, %v343_v63, %v345_v9  ;;  %v482_v20 = vrot.slane %v476_v11, 1  ;;  %v493_v21 = vmul.f32 %v1087_v13, %v1041_v52 }
  0xb1   :  { %v1183_v62 = vadd.f32 %v188_v41, %v175_v40  ;;  %v176_v47 = vadd.f32 %v172_v45, %v156_v44  ;;  %v631_v34 = vmul.f32 %v1090_v14, %v1154_v22  ;;  %v633_v45 = vmul.f32 %v1090_v14, %v1229_v18 }
  0xb2   :  { %243 = vrot.lane.b32.xlu0 %v240_v48, %s902_s29  ;;  %v190_v48 = vsel %vm185_vm5, %v187_v25, %v189_v26  ;;  %v494_v25 = vmul.f32 %v1087_v13, %v1200_v53  ;;  %v499_v41 = vrot.slane %v493_v21, 2  ;;  %v431_v29 = vsel %vm167_vm4, %v429_v5, %v430_v23 }
  0xb3   :  { %245 = vrot.lane.b32.xlu1 %v242_v58, %s902_s29  ;;  %v1202_v55 = vadd.f32 %v190_v48, %v176_v47  ;;  %v1209_v58 = vsel %vm167_vm4, %v325_v49, %v326_v24  ;;  %v637_v44 = vrot.slane %v631_v34, 1  ;;  %v650_v47 = vmul.f32 %v1105_v27, %v1229_v18 }
  0xb4   :  { %v501_v37 = vrot.slane %v494_v25, 2  ;;  %v543_v2 = vstv %s1215_s19  ;;  %v450_v48 = vrot.slane %v1176_v43, 2  ;;  %v523_v59 = vmul.f32 %v1063_v1, %v1039_v51 }
  0xb5   :  { %v524_v5 = vmul.f32 %v1063_v1, %v1041_v52  ;;  %v546_v11 = vmul.f32 %v543_v2, %v1200_v53  ;;  %v599_v34 = vstv %s821_s20 }
  0xb6   :  { %278 = vrot.lane.b32.xlu0 %v275_v12, %s903_s6  ;;  %v1223_v12 = vsel %vm185_vm5, %v342_v4, %v343_v63  ;;  %v1259_v26 = vsel %vm185_vm5, %v499_v41, %v501_v37  ;;  %v525_v4 = vmul.f32 %v1063_v1, %v1200_v53 }
  0xb7   :  { %280 = vrot.lane.b32.xlu1 %v277_v15, %s903_s6  ;;  %v481_v15 = vrot.slane %v475_v61, 1  ;;  %v529_v61 = vrot.slane %v523_v59, 1 }
  0xb8   :  { %v532_v9 = vrot.slane %v525_v4, 1 }
  0xb9   :  { %v1245_v40 = vsel %vm167_vm4, %v481_v15, %v482_v20  ;;  %v578_v15 = vstv %s1266_s1 }
  0xba   :  { %299 = vrot.lane.b32.xlu0 %v296_v16, %s903_s6  ;;  %v477_v16 = vmul.f32 %v1082_v10, %v1200_v53  ;;  %v445_v10 = vmul.f32 %v1060_v0, %v1008_v39  ;;  %v579_v21 = vmul.f32 %v578_v15, %v1039_v51  ;;  %v580_v25 = vmul.f32 %v578_v15, %v1041_v52 }
  0xbb   :  { %301 = vrot.lane.b32.xlu1 %v298_v17, %s903_s6  ;;  %v492_v17 = vmul.f32 %v1087_v13, %v1039_v51  ;;  %v632_v13 = vmul.f32 %v1090_v14, %v1162_v35  ;;  %v649_v14 = vmul.f32 %v1105_v27, %v1162_v35  ;;  %v657_v27 = vrot.slane %v650_v47, 2 }
  0xbc   :  { %v484_v28 = vrot.slane %v477_v16, 1  ;;  %v451_v56 = vrot.slane %v445_v10, 2  ;;  %v585_v37 = vrot.slane %v579_v21, 1 }
  0xbd   :  { %v498_v32 = vrot.slane %v492_v17, 2  ;;  %v638_v54 = vrot.slane %v632_v13, 1  ;;  %v655_v24 = vrot.slane %v649_v14, 2  ;;  %v586_v13 = vrot.slane %v580_v25, 1 }
  0xbe   :  { %669 = vrot.lane.b32.xlu0 %v665_v42, %s902_s29  ;;  %v1251_v42 = vsel %vm167_vm4, %v482_v20, %v484_v28  ;;  %v452_v63 = vsel %vm185_vm5, %v450_v48, %v451_v56  ;;  %v553_v28 = vrot.slane %v546_v11, 2  ;;  %v755_v25 = vstv %s830_s25 }
  0xbf   :  { %671 = vrot.lane.b32.xlu1 %v666_v46, %s902_s29  ;;  %v640_v46 = vrot.slane %v633_v45, 1  ;;  %v1300_v60 = vsel %vm185_vm5, %v655_v24, %v657_v27  ;;  %v699_v27 = vstv %s827_s23 }
  0xc1   :  { %v1284_v49 = vsel %vm167_vm4, %v638_v54, %v640_v46 }
  0xc2   :  { %378 = vrot.lane.b32.xlu0 %v375_v30, %s902_s29  ;;  %v432_v30 = vrot.slane %v1166_v36, 1  ;;  %v446_v36 = vmul.f32 %v1060_v0, %v1110_v33  ;;  %v1280_v0 = vsel %vm167_vm4, %v637_v44, %v638_v54  ;;  %v654_v33 = vrot.slane %v648_v6, 2 }
  0xc3   :  { %380 = vrot.lane.b32.xlu1 %v377_v31, %s902_s29  ;;  %v1256_v31 = vsel %vm185_vm5, %v498_v32, %v499_v41  ;;  %v581_v32 = vmul.f32 %v578_v15, %v1200_v53  ;;  %v601_v44 = vmul.f32 %v599_v34, %v1041_v52  ;;  %v602_v6 = vmul.f32 %v599_v34, %v1200_v53 }
  0xc4   :  { %v433_v50 = vsel %vm167_vm4, %v430_v23, %v432_v30  ;;  %v453_v43 = vrot.slane %v446_v36, 2  ;;  %v1297_v57 = vsel %vm185_vm5, %v654_v33, %v655_v24  ;;  %v544_v23 = vmul.f32 %v543_v2, %v1039_v51 }
  0xc5   :  { %v600_v30 = vmul.f32 %v599_v34, %v1039_v51  ;;  %v588_v54 = vrot.slane %v581_v32, 1  ;;  %v587_v36 = vsel %vm167_vm4, %v585_v37, %v586_v13  ;;  %v607_v14 = vrot.slane %v601_v44, 2 }
  0xc6   :  { %399 = vrot.lane.b32.xlu0 %v396_v8, %s902_s29  ;;  %v545_v8 = vmul.f32 %v543_v2, %v1041_v52  ;;  %v454_v1 = vsel %vm185_vm5, %v451_v56, %v453_v43  ;;  %v550_v16 = vrot.slane %v544_v23, 2  ;;  %v678_v2 = vstv %s826_s21 }
  0xc7   :  { %401 = vrot.lane.b32.xlu1 %v398_v3, %s902_s29  ;;  %v530_v3 = vrot.slane %v524_v5, 1  ;;  %v606_v46 = vrot.slane %v600_v30, 2  ;;  %v589_v47 = vsel %vm167_vm4, %v586_v13, %v588_v54  ;;  %v720_v33 = vstv %s1319_s22 }
  0xc8   :  { %v551_v17 = vrot.slane %v545_v8, 2  ;;  %v679_v53 = vmul.f32 %v678_v2, %v1154_v22  ;;  %v680_v24 = vmul.f32 %v678_v2, %v1162_v35  ;;  %v681_v56 = vmul.f32 %v678_v2, %v1229_v18 }
  0xc9   :  { %v531_v20 = vsel %vm167_vm4, %v529_v61, %v530_v3  ;;  %v533_v10 = vsel %vm167_vm4, %v530_v3, %v532_v9  ;;  %v608_v48 = vsel %vm185_vm5, %v606_v46, %v607_v14  ;;  %v721_v59 = vmul.f32 %v720_v33, %v1154_v22 }
  0xca   :  { %434 = vrot.lane.b32.xlu0 %v431_v29, %s903_s6  ;;  %v552_v41 = vsel %vm185_vm5, %v550_v16, %v551_v17  ;;  %v554_v45 = vsel %vm185_vm5, %v551_v17, %v553_v28  ;;  %v609_v29 = vrot.slane %v602_v6, 2  ;;  %v700_v5 = vmul.f32 %v699_v27, %v1154_v22 }
  0xcb   :  { %436 = vrot.lane.b32.xlu1 %v433_v50, %s903_s6  ;;  %v701_v43 = vmul.f32 %v699_v27, %v1162_v35  ;;  %v722_v4 = vmul.f32 %v720_v33, %v1162_v35  ;;  %v685_v23 = vrot.slane %v679_v53, 1  ;;  %v686_v8 = vrot.slane %v680_v24, 1 }
  0xcc   :  { %v610_v50 = vsel %vm185_vm5, %v607_v14, %v609_v29  ;;  %v702_v61 = vmul.f32 %v699_v27, %v1229_v18  ;;  %v734_v3 = vstv %s829_s24  ;;  %v756_v34 = vmul.f32 %v755_v25, %v1154_v22 }
  0xcd   :  { %v707_v9 = vrot.slane %v701_v43, 2  ;;  %v687_v11 = vsel %vm167_vm4, %v685_v23, %v686_v8  ;;  %v735_v15 = vmul.f32 %v734_v3, %v1154_v22  ;;  %v736_v16 = vmul.f32 %v734_v3, %v1162_v35 }
  0xce   :  { %455 = vrot.lane.b32.xlu0 %v452_v63, %s903_s6  ;;  %v688_v63 = vrot.slane %v681_v56, 1  ;;  %v737_v21 = vmul.f32 %v734_v3, %v1229_v18  ;;  %v758_v30 = vmul.f32 %v755_v25, %v1229_v18 }
  0xcf   :  { %457 = vrot.lane.b32.xlu1 %v454_v1, %s903_s6  ;;  %v706_v1 = vrot.slane %v700_v5, 2  ;;  %v741_v28 = vrot.slane %v735_v15, 1  ;;  %v742_v32 = vrot.slane %v736_v16, 1 }
  0xd0   :  { %v689_v17 = vsel %vm167_vm4, %v686_v8, %v688_v63  ;;  %v744_v13 = vrot.slane %v737_v21, 1 }
  0xd1   :  { %v743_v44 = vsel %vm167_vm4, %v741_v28, %v742_v32 }
  0xd2   :  { %534 = vrot.lane.b32.xlu0 %v531_v20, %s902_s29  ;;  %v709_v20 = vrot.slane %v702_v61, 2  ;;  %v745_v6 = vsel %vm167_vm4, %v742_v32, %v744_v13 }
  0xd3   :  { %536 = vrot.lane.b32.xlu1 %v533_v10, %s902_s29  ;;  %v708_v10 = vsel %vm185_vm5, %v706_v1, %v707_v9 }
  0xd4   :  { %v710_v37 = vsel %vm185_vm5, %v707_v9, %v709_v20  ;;  %v312_v20 = vstv %s804_s26 }
  0xd6   :  { %555 = vrot.lane.b32.xlu0 %v552_v41, %s902_s29  ;;  %v757_v41 = vmul.f32 %v755_v25, %v1162_v35 }
  0xd7   :  { %557 = vrot.lane.b32.xlu1 %v554_v45, %s902_s29  ;;  %v762_v45 = vrot.slane %v756_v34, 2 }
  0xd8   :  { %v763_v54 = vrot.slane %v757_v41, 2 }
  0xda   :  { %590 = vrot.lane.b32.xlu0 %v587_v36, %s903_s6  ;;  %v765_v36 = vrot.slane %v758_v30, 2  ;;  %v764_v46 = vsel %vm185_vm5, %v762_v45, %v763_v54 }
  0xdb   :  { %592 = vrot.lane.b32.xlu1 %v589_v47, %s903_s6 }
  0xdc   :  { %v766_v14 = vsel %vm185_vm5, %v763_v54, %v765_v36 }
  0xde   :  { %611 = vrot.lane.b32.xlu0 %v608_v48, %s903_s6 }
  0xdf   :  { %613 = vrot.lane.b32.xlu1 %v610_v50, %s903_s6 }
  0xe2   :  { %725 = vrot.lane.b32.xlu0 %v721_v59, %s903_s6 }
  0xe3   :  { %727 = vrot.lane.b32.xlu1 %v722_v4, %s903_s6 }
  0xe6   :  { %690 = vrot.lane.b32.xlu0 %v687_v11, %s902_s29 }
  0xe7   :  { %692 = vrot.lane.b32.xlu1 %v689_v17, %s902_s29 }
  0xea   :  { %711 = vrot.lane.b32.xlu0 %v708_v10, %s902_s29 }
  0xeb   :  { %713 = vrot.lane.b32.xlu1 %v710_v37, %s902_s29  ;;  %s904_s29 = smov [#allocation8]  }
  0xec   :  { %s783_s30 = sshll.u32 %s904_s29, 4  ;;  %s784_s30 = int_to_ptr.vmem [resolvable:$true] %s783_s30 }
  0xed   :  { %s869_s3 = scalar_lea.vmem %s784_s30, 256  ;;  %p874_p6 = scmp.lt.s32.totalorder %s784_s30, %s784_s30 }
  0xee   :  { %746 = vrot.lane.b32.xlu0 %v743_v44, %s903_s6  ;;  %p870_p5 = scmp.ne.s32.totalorder %s784_s30, %s869_s3  ;;  %p875_p7 = scmp.lt.s32.totalorder %s869_s3, %s869_s3 }
  0xef   :  { %748 = vrot.lane.b32.xlu1 %v745_v6, %s903_s6 }
  0xf0   :  { %p876_p8 = por %p875_p7, %p874_p6 }
  0xf2   :  { %767 = vrot.lane.b32.xlu0 %v764_v46, %s903_s6  ;;  %p877_p9 = pnand %p876_p8, %p870_p5 }
  0xf3   :  { %769 = vrot.lane.b32.xlu1 %v766_v14, %s903_s6 }
 0x105   :  { %v202_v18 = vpop.permute.xlu0 %201 }
 0x106   :  { %v207_v43 = vadd.f32 %v202_v18, %v1183_v62  ;;  %v313_v62 = vmul.f32 %v312_v20, %v1006_v38 }
 0x109   :  { %v204_v47 = vpop.permute.xlu1 %203  ;;  %v258_v29 = vpop.permute.xlu0 %257 }
 0x10a   :  { %v208_v23 = vadd.f32 %v204_v47, %v1202_v55  ;;  %v314_v55 = vmul.f32 %v312_v20, %v1008_v39 }
 0x10d   :  { %v260_v2 = vpop.permute.xlu1 %259 }
 0x110   :  { %v358_v33 = vpop.permute.xlu0 %357 }
 0x111   :  { %v360_v48 = vpop.permute.xlu1 %359 }
 0x114   :  { %v414_v53 = vpop.permute.xlu0 %413 }
 0x115   :  { %v416_v24 = vpop.permute.xlu1 %415 }
 0x118   :  { %v1368_v27 = vpop.permute.xlu0 %513 }
 0x119   :  { %v1370_v50 = vpop.permute.xlu1 %515 }
 0x11c   :  { %v1372_v56 = vpop.permute.xlu0 %569 }
 0x11d   :  { %v1374_v59 = vpop.permute.xlu1 %571 }
 0x120   :  { %v223_v5 = vpop.permute.xlu0 %222 }
 0x121   :  { %v225_v4 = vpop.permute.xlu1 %224  ;;  %v228_v8 = vadd.f32 %v223_v5, %v207_v43 }
 0x122   :  { %v229_v63 = vadd.f32 %v225_v4, %v208_v23 }
 0x124   :  { %v244_v61 = vpop.permute.xlu0 %243 }
 0x125   :  { %v249_v3 = vadd.f32 %v244_v61, %v228_v8  ;;  %v246_v1 = vpop.permute.xlu1 %245 }
 0x126   :  { %v250_v9 = vadd.f32 %v246_v1, %v229_v63 }
 0x127   :  { %v263_v11 = vadd.f32 %v258_v29, %v249_v3 }
 0x128   :  { %v279_v15 = vpop.permute.xlu0 %278  ;;  %v264_v16 = vadd.f32 %v260_v2, %v250_v9 }
 0x129   :  { %v281_v17 = vpop.permute.xlu1 %280  ;;  %v284_v21 = vadd.f32 %v279_v15, %v263_v11 }
 0x12a   :  { %v285_v25 = vadd.f32 %v281_v17, %v264_v16 }
 0x12c   :  { %v300_v10 = vpop.permute.xlu0 %299 }
 0x12d   :  { %v305_v28 = vadd.f32 %v300_v10, %v284_v21  ;;  %v302_v32 = vpop.permute.xlu1 %301 }
 0x12e   :  { %v306_v34 = vadd.f32 %v302_v32, %v285_v25 }
 0x12f   :  { %v315_v41 = vadd.f32 %v313_v62, %v305_v28 }
 0x130   :  { %v316_v37 = vadd.f32 %v314_v55, %v306_v34  ;;  %v1380_v13 = vpop.permute.xlu0 %669 }
 0x131   :  { %v332_v30 = vadd.f32 %v1209_v58, %v315_v41  ;;  %v1383_v44 = vpop.permute.xlu1 %671 }
 0x132   :  { %v333_v45 = vadd.f32 %v1218_v7, %v316_v37  ;;  %v468_v7 = vstv %s813_s27 }
 0x133   :  { %v349_v54 = vadd.f32 %v1223_v12, %v332_v30 }
 0x134   :  { %v379_v6 = vpop.permute.xlu0 %378  ;;  %v350_v38 = vadd.f32 %v1232_v19, %v333_v45  ;;  %v469_v19 = vmul.f32 %v468_v7, %v1039_v51 }
 0x135   :  { %v363_v36 = vadd.f32 %v358_v33, %v349_v54  ;;  %v381_v46 = vpop.permute.xlu1 %380 }
 0x136   :  { %v364_v14 = vadd.f32 %v360_v48, %v350_v38  ;;  %v470_v48 = vmul.f32 %v468_v7, %v1041_v52 }
 0x137   :  { %v384_v39 = vadd.f32 %v379_v6, %v363_v36 }
 0x138   :  { %v385_v18 = vadd.f32 %v381_v46, %v364_v14  ;;  %v400_v47 = vpop.permute.xlu0 %399 }
 0x139   :  { %v405_v29 = vadd.f32 %v400_v47, %v384_v39  ;;  %v402_v2 = vpop.permute.xlu1 %401 }
 0x13a   :  { %v406_v5 = vadd.f32 %v402_v2, %v385_v18 }
 0x13b   :  { %v419_v58 = vadd.f32 %v414_v53, %v405_v29 }
 0x13c   :  { %v435_v43 = vpop.permute.xlu0 %434  ;;  %v420_v4 = vadd.f32 %v416_v24, %v406_v5 }
 0x13d   :  { %v437_v23 = vpop.permute.xlu1 %436  ;;  %v440_v8 = vadd.f32 %v435_v43, %v419_v58 }
 0x13e   :  { %v441_v12 = vadd.f32 %v437_v23, %v420_v4 }
 0x140   :  { %v456_v63 = vpop.permute.xlu0 %455 }
 0x141   :  { %v461_v33 = vadd.f32 %v456_v63, %v440_v8  ;;  %v458_v61 = vpop.permute.xlu1 %457 }
 0x142   :  { %v462_v3 = vadd.f32 %v458_v61, %v441_v12 }
 0x143   :  { %v471_v1 = vadd.f32 %v469_v19, %v461_v33 }
 0x144   :  { %v472_v9 = vadd.f32 %v470_v48, %v462_v3  ;;  %v535_v11 = vpop.permute.xlu0 %534 }
 0x145   :  { %v488_v15 = vadd.f32 %v1245_v40, %v471_v1  ;;  %v537_v53 = vpop.permute.xlu1 %536 }
 0x146   :  { %v489_v24 = vadd.f32 %v1251_v42, %v472_v9 }
 0x147   :  { %v505_v16 = vadd.f32 %v1256_v31, %v488_v15  ;;  %v624_v31 = vstv %s822_s28 }
 0x148   :  { %v506_v17 = vadd.f32 %v1259_v26, %v489_v24  ;;  %v556_v20 = vpop.permute.xlu0 %555 }
 0x149   :  { %v519_v51 = vadd.f32 %v1368_v27, %v505_v16  ;;  %v558_v21 = vpop.permute.xlu1 %557  ;;  %v625_v27 = vmul.f32 %v624_v31, %v1154_v22 }
 0x14a   :  { %v520_v52 = vadd.f32 %v1370_v50, %v506_v17  ;;  %v626_v50 = vmul.f32 %v624_v31, %v1162_v35 }
 0x14b   :  { %v540_v25 = vadd.f32 %v535_v11, %v519_v51 }
 0x14c   :  { %v541_v10 = vadd.f32 %v537_v53, %v520_v52  ;;  %v591_v62 = vpop.permute.xlu0 %590 }
 0x14d   :  { %v561_v28 = vadd.f32 %v556_v20, %v540_v25  ;;  %v593_v32 = vpop.permute.xlu1 %592 }
 0x14e   :  { %v562_v40 = vadd.f32 %v558_v21, %v541_v10 }
 0x14f   :  { %v575_v55 = vadd.f32 %v1372_v56, %v561_v28 }
 0x150   :  { %v576_v42 = vadd.f32 %v1374_v59, %v562_v40  ;;  %v612_v34 = vpop.permute.xlu0 %611 }
 0x151   :  { %v596_v26 = vadd.f32 %v591_v62, %v575_v55  ;;  %v614_v41 = vpop.permute.xlu1 %613 }
 0x152   :  { %v597_v37 = vadd.f32 %v593_v32, %v576_v42 }
 0x153   :  { %v617_v30 = vadd.f32 %v612_v34, %v596_v26 }
 0x154   :  { %v618_v45 = vadd.f32 %v614_v41, %v597_v37  ;;  %v726_v54 = vpop.permute.xlu0 %725 }
 0x155   :  { %v627_v6 = vadd.f32 %v625_v27, %v617_v30  ;;  %v728_v38 = vpop.permute.xlu1 %727 }
 0x156   :  { %v628_v36 = vadd.f32 %v626_v50, %v618_v45 }
 0x157   :  { %v644_v46 = vadd.f32 %v1280_v0, %v627_v6 }
 0x158   :  { %v645_v56 = vadd.f32 %v1284_v49, %v628_v36  ;;  %v691_v59 = vpop.permute.xlu0 %690 }
 0x159   :  { %v661_v14 = vadd.f32 %v1297_v57, %v644_v46  ;;  %v693_v39 = vpop.permute.xlu1 %692 }
 0x15a   :  { %v662_v18 = vadd.f32 %v1300_v60, %v645_v56 }
 0x15b   :  { %v675_v22 = vadd.f32 %v1380_v13, %v661_v14 }
 0x15c   :  { %v676_v47 = vadd.f32 %v1383_v44, %v662_v18  ;;  %v712_v35 = vpop.permute.xlu0 %711 }
 0x15d   :  { %v696_v29 = vadd.f32 %v691_v59, %v675_v22  ;;  %v714_v2 = vpop.permute.xlu1 %713 }
 0x15e   :  { %v697_v5 = vadd.f32 %v693_v39, %v676_v47 }
 0x15f   :  { %v717_v58 = vadd.f32 %v712_v35, %v696_v29 }
 0x160   :  { %v718_v43 = vadd.f32 %v714_v2, %v697_v5  ;;  %v747_v4 = vpop.permute.xlu0 %746 }
 0x161   :  { %v731_v0 = vadd.f32 %v726_v54, %v717_v58  ;;  %v749_v23 = vpop.permute.xlu1 %748 }
 0x162   :  { %v732_v49 = vadd.f32 %v728_v38, %v718_v43 }
 0x163   :  { %v752_v7 = vadd.f32 %v747_v4, %v731_v0 }
 0x164   :  { %v753_v57 = vadd.f32 %v749_v23, %v732_v49  ;;  %v768_v8 = vpop.permute.xlu0 %767 }
 0x165   :  { %v773_v60 = vadd.f32 %v768_v8, %v752_v7  ;;  %v770_v13 = vpop.permute.xlu1 %769 }
 0x166   :  { %v774_v12 = vadd.f32 %v770_v13, %v753_v57 }
 0x167   :  { %776 = vst.msk [vmem:[#allocation8] sm:$0xff] %vm775_vm6, %v773_v60 }
 0x168   :  { %777 = vst.msk [vmem:[#allocation8 + $0x8] sm:$0xff] %vm775_vm6, %v774_v12 }
 0x169   :  { %880 = shalt.err (!%p877_p9)
}
 0x16a   :  { %789 = dma.vmem_to_hbm [thread:$0]  %s784_s30, 256, %s1414_s2, [#allocation5], %s897_s15, %s897_s15, %s898_s16  }
 0x16b   :  { %893 = dma.done.wait [#allocation5], 256  }
 0x16c   :  { %894 = vsyncadd [#allocation5], 4294967040 }
 0x16d   :  { %793 = vsyncpa [#allocation4], 1 }
 0x16e   :  { %794 = vsyncpa [#allocation5], 1 }
 0x16f   :  { %795 = vsyncpa [#allocation6], 1 }

</bundles_post_ra>
